<compile_context>
chip_gen: v6e
topology: v6e:2x2x1
jax: 0.10.0
libtpu: 0.0.40
codegen_flags: <defaults>
</compile_context>

<pallas_src>
import math
import jax
import jax.numpy as jnp
import numpy as np
from jax.experimental import pallas as pl
from jax.experimental.pallas import tpu as pltpu


def _round_up(x, m):
    return (x + m - 1) // m * m


# ----------------------------- Pallas kernel ------------------------------ #
def output_layer_kernel(p_ref, a_ref, c_ref, o_ref, acc_ref):
    # p_ref: (1, tk)   source pred_prob slab (f32)
    # a_ref: (tk, tn)  adjacency tile (src x dst), bf16 0/1
    # c_ref: (1, tn)   special_cost tile for this dst slab (f32)
    # o_ref: (1, tn)   loss_for_sumOneCost2 tile (f32)
    # acc_ref: (1, tn) f32 VMEM accumulator, resident across the K axis
    k = pl.program_id(1)

    @pl.when(k == 0)
    def _():
        acc_ref[...] = jnp.zeros_like(acc_ref)

    # bf16 0/1 -> f32 in-register: exact, and halves the HBM bytes of A.
    a = a_ref[...].astype(jnp.float32)
    acc_ref[...] += jnp.dot(p_ref[...], a, preferred_element_type=jnp.float32)

    @pl.when(k == pl.num_programs(1) - 1)
    def _():
        h = acc_ref[...] - 1.0
        o_ref[...] = (h * h) * c_ref[...]


# ------------------------- one-time graph preparation ---------------------- #
def prepare_adjacency(adj, *, max_tk=2048, max_tn=512):
    """Cast the dense adjacency (0/1) to bf16 and zero-pad to tile multiples.

    Done ONCE at graph construction (not per forward), eliminating the per-call
    N^2 f32 cast/copy and halving adjacency HBM traffic.  Returns the padded
    bf16 adjacency plus the (tk, tn) tile sizes it was padded for.
    """
    Ns, Nd = adj.shape
    tk = max_tk if Ns > max_tk else _round_up(max(Ns, 16), 16)    # src/K tile
    tn = max_tn if Nd > max_tn else _round_up(max(Nd, 128), 128)  # dst tile (lane axis)
    Ns_pad, Nd_pad = _round_up(Ns, tk), _round_up(Nd, tn)
    a = jnp.zeros((Ns_pad, Nd_pad), jnp.bfloat16)
    a = a.at[:Ns, :Nd].set(adj.astype(jnp.bfloat16))
    return a, tk, tn


# ------------------------------- forward pass ------------------------------ #
def output_layer_forward(pred_prob, adj_prep, special_cost, tk, tn):
    """pred_prob: (N_src, 1) f32, adj_prep: padded bf16 (Ns_pad, Nd_pad) from
    prepare_adjacency, special_cost: (N_dst,) f32.
    Returns loss_for_sumOneCost2: (N_dst,) f32."""
    Ns_pad, Nd_pad = adj_prep.shape
    Ns, Nd = pred_prob.shape[0], special_cost.shape[0]

    # Cheap per-call padding of the two length-N vectors (padded src rows are 0
    # so they add nothing; padded dst cols are sliced off below).
    p = jnp.zeros((1, Ns_pad), jnp.float32).at[0, :Ns].set(
        pred_prob.reshape(Ns).astype(jnp.float32))
    c = jnp.zeros((1, Nd_pad), jnp.float32).at[0, :Nd].set(
        special_cost.astype(jnp.float32))

    out = pl.pallas_call(
        output_layer_kernel,
        out_shape=jax.ShapeDtypeStruct((1, Nd_pad), jnp.float32),
        grid_spec=pltpu.PrefetchScalarGridSpec(
            num_scalar_prefetch=0,
            # dst axis first (parallel -> megacore sharding on v7x),
            # src/K reduction axis last (arbitrary).
            grid=(Nd_pad // tn, Ns_pad // tk),
            in_specs=[
                pl.BlockSpec((1, tk), lambda j, k: (0, k)),   # pred_prob slab
                pl.BlockSpec((tk, tn), lambda j, k: (k, j)),  # adjacency tile (bf16)
                pl.BlockSpec((1, tn), lambda j, k: (0, j)),   # special_cost tile
            ],
            out_specs=pl.BlockSpec((1, tn), lambda j, k: (0, j)),
            scratch_shapes=[pltpu.VMEM((1, tn), jnp.float32)],
        ),
        compiler_params=pltpu.CompilerParams(
            dimension_semantics=("parallel", "arbitrary")),
    )(p, adj_prep, c)
    return out[0, :Nd]

# TODO(synk): a sparse CSC / scalar-prefetch formulation would cut adjacency
# traffic ~10x at 10% density; kept dense here to mirror g.update_all exactly.


# ------------------------- parameter initialization ------------------------ #
def xavier_uniform(key, shape, gain):
    fan_in, fan_out = shape[-2], shape[-1]
    a = gain * math.sqrt(6.0 / (fan_in + fan_out))
    return jax.random.uniform(key, shape, jnp.float32, -a, a)


def init_output_layer_params(key, in_feat, out_feat, num_of_edge_types,
                             num_bases=-1):
    num_rels = num_of_edge_types
    if num_bases <= 0 or num_bases > num_rels:
        num_bases = num_rels
    gain = math.sqrt(2.0)  # calculate_gain('relu')
    k_w, k_c = jax.random.split(key)
    params = {"weight": xavier_uniform(k_w, (num_bases, in_feat, out_feat), gain)}
    if num_bases < num_rels:
        params["w_comp"] = xavier_uniform(k_c, (num_rels, num_bases), gain)
    return params  # unused in forward(), kept for parity with the nn.Module


# ----------------------------------- main ---------------------------------- #
if __name__ == "__main__":
    key = jax.random.PRNGKey(0)
    k_param, k_edge, k_prob, k_cost = jax.random.split(key, 4)

    # Module hyperparameters (small, consistent with the ctor signature).
    in_feat, out_feat = 32, 16
    num_of_node_types, num_of_edge_types = 3, 4
    _params = init_output_layer_params(k_param, in_feat, out_feat,
                                       num_of_edge_types, num_bases=-1)

    # Synthetic graph: N nodes, dense adjacency A[src, dst] from random
    # Bernoulli edges (deterministic under PRNGKey(0)).
    N = 256
    adj = (jax.random.uniform(k_edge, (N, N)) < 0.1).astype(jnp.float32)
    pred_prob = jax.random.uniform(k_prob, (N, 1), jnp.float32)   # node 'pred_prob'
    special_cost = jax.random.uniform(k_cost, (N,), jnp.float32)  # node 'special_cost'

    # One-time graph preparation (bf16 adjacency, padded to tile multiples).
    adj_prep, tk, tn = prepare_adjacency(adj)

    loss = output_layer_forward(pred_prob, adj_prep, special_cost, tk, tn)
    loss = jax.block_until_ready(loss)

    # Pure-JAX reference of the update_all semantics (full f32).
    s_ref = jnp.squeeze(pred_prob) @ adj                 # sum of incoming msgs
    ref = (s_ref - 1.0) ** 2 * special_cost
    np.testing.assert_allclose(np.asarray(loss), np.asarray(ref),
                               rtol=1e-5, atol=1e-5)

    print("KERNEL_OK")
</pallas_src>

<mosaic_0001>
module attributes {stable_mosaic.version = 11 : i64} {
  func.func @output_layer_kernel(%arg0: i32, %arg1: i32, %arg2: memref<1x256xf32, #tpu.memory_space<vmem>>, %arg3: memref<256x256xbf16, #tpu.memory_space<vmem>>, %arg4: memref<1x256xf32, #tpu.memory_space<vmem>>, %arg5: memref<1x256xf32, #tpu.memory_space<vmem>>, %arg6: memref<1x256xf32, #tpu.memory_space<vmem>>) attributes {dimension_semantics = [#tpu.dimension_semantics<parallel>, #tpu.dimension_semantics<arbitrary>], iteration_bounds = array<i64: 1, 1>, scalar_prefetch = 0 : i64, scratch_operands = 1 : i64, tpu.core_type = #tpu.core_type<tc>, window_params = [{transform_indices = @transform_0, window_bounds = array<i64: 1, 256>}, {transform_indices = @transform_1, window_bounds = array<i64: 256, 256>}, {transform_indices = @transform_2, window_bounds = array<i64: 1, 256>}, {transform_indices = @transform_3, window_bounds = array<i64: 1, 256>}]} {
    %c0_i32 = arith.constant 0 : i32
    %0 = arith.cmpi eq, %arg1, %c0_i32 : i32
    %1 = arith.extui %0 : i1 to i32
    %c0_i32_0 = arith.constant 0 : i32
    %2 = arith.cmpi ne, %1, %c0_i32_0 : i32
    scf.if %2 {
      %cst_10 = arith.constant 0.000000e+00 : f32
      %13 = vector.broadcast %cst_10 : f32 to vector<1x256xf32>
      %c0_11 = arith.constant 0 : index
      %c0_12 = arith.constant 0 : index
      %14 = vector.load %arg6[%c0_11, %c0_12] : memref<1x256xf32, #tpu.memory_space<vmem>>, vector<1x256xf32>
      tpu.vector_store %arg6[%c0_11, %c0_12], %13 {strides = array<i32>} : memref<1x256xf32, #tpu.memory_space<vmem>>, vector<1x256xf32>,
    } else {
    }
    %c0 = arith.constant 0 : index
    %c0_1 = arith.constant 0 : index
    %3 = vector.load %arg3[%c0, %c0_1] : memref<256x256xbf16, #tpu.memory_space<vmem>>, vector<256x256xbf16>
    %4 = arith.extf %3 : vector<256x256xbf16> to vector<256x256xf32>
    %c0_2 = arith.constant 0 : index
    %c0_3 = arith.constant 0 : index
    %5 = vector.load %arg6[%c0_2, %c0_3] : memref<1x256xf32, #tpu.memory_space<vmem>>, vector<1x256xf32>
    %c0_4 = arith.constant 0 : index
    %c0_5 = arith.constant 0 : index
    %6 = vector.load %arg2[%c0_4, %c0_5] : memref<1x256xf32, #tpu.memory_space<vmem>>, vector<1x256xf32>
    %cst = arith.constant dense<0.000000e+00> : vector<1x256xf32>
    %7 = tpu.matmul %6, %4, %cst {dimension_numbers = #tpu.dot_dimension_numbers<[1], [0], [0], [1], [0, 0, 1, 1], [], []>} : vector<1x256xf32>, vector<256x256xf32>, vector<1x256xf32> -> vector<1x256xf32>
    %8 = arith.addf %5, %7 : vector<1x256xf32>
    %c0_6 = arith.constant 0 : index
    %c0_7 = arith.constant 0 : index
    %9 = vector.load %arg6[%c0_6, %c0_7] : memref<1x256xf32, #tpu.memory_space<vmem>>, vector<1x256xf32>
    tpu.vector_store %arg6[%c0_6, %c0_7], %8 {strides = array<i32>} : memref<1x256xf32, #tpu.memory_space<vmem>>, vector<1x256xf32>,
    %c0_i32_8 = arith.constant 0 : i32
    %10 = arith.cmpi eq, %arg1, %c0_i32_8 : i32
    %11 = arith.extui %10 : i1 to i32
    %c0_i32_9 = arith.constant 0 : i32
    %12 = arith.cmpi ne, %11, %c0_i32_9 : i32
    scf.if %12 {
      %c0_10 = arith.constant 0 : index
      %c0_11 = arith.constant 0 : index
      %13 = vector.load %arg6[%c0_10, %c0_11] : memref<1x256xf32, #tpu.memory_space<vmem>>, vector<1x256xf32>
      %cst_12 = arith.constant 1.000000e+00 : f32
      %14 = vector.broadcast %cst_12 : f32 to vector<1x256xf32>
      %15 = arith.subf %13, %14 : vector<1x256xf32>
      %16 = arith.mulf %15, %15 : vector<1x256xf32>
      %c0_13 = arith.constant 0 : index
      %c0_14 = arith.constant 0 : index
      %17 = vector.load %arg4[%c0_13, %c0_14] : memref<1x256xf32, #tpu.memory_space<vmem>>, vector<1x256xf32>
      %18 = arith.mulf %16, %17 : vector<1x256xf32>
      %c0_15 = arith.constant 0 : index
      %c0_16 = arith.constant 0 : index
      %19 = vector.load %arg5[%c0_15, %c0_16] : memref<1x256xf32, #tpu.memory_space<vmem>>, vector<1x256xf32>
      tpu.vector_store %arg5[%c0_15, %c0_16], %18 {strides = array<i32>} : memref<1x256xf32, #tpu.memory_space<vmem>>, vector<1x256xf32>,
    } else {
    }
    return
  }
  func.func @transform_0(%arg0: i32, %arg1: i32) -> (i32, i32) {
    %c0_i32 = arith.constant 0 : i32
    %c0_i32_0 = arith.constant 0 : i32
    return %c0_i32, %arg1 : i32, i32
  }
  func.func @transform_1(%arg0: i32, %arg1: i32) -> (i32, i32) {
    %c0_i32 = arith.constant 0 : i32
    return %arg1, %arg0 : i32, i32
  }
  func.func @transform_2(%arg0: i32, %arg1: i32) -> (i32, i32) {
    %c0_i32 = arith.constant 0 : i32
    %c0_i32_0 = arith.constant 0 : i32
    return %c0_i32, %arg0 : i32, i32
  }
  func.func @transform_3(%arg0: i32, %arg1: i32) -> (i32, i32) {
    %c0_i32 = arith.constant 0 : i32
    %c0_i32_0 = arith.constant 0 : i32
    return %c0_i32, %arg0 : i32, i32
  }
}

</mosaic_0001>

<bundles_post_ra>
// kernel: tpu_custom_call.1
= control target key start
LH: loop header
LB: loop body
LE: loop exit
PB: predicated region body
PF: predicated region fallthrough
CT: control target
= control target key end

     0   :  { %8 = vsyncpa [#allocation4], 0  ;;  %s413_s0 = inlined_call_operand.hbm [shape: f32[1,256], index: 0, kind: input, shape index: {}]   ;;  %s414_s1 = inlined_call_operand.hbm [shape: bf16[256,256], index: 1, kind: input, shape index: {}]   ;;  %s415_s2 = inlined_call_operand.vmem [shape: f32[1,256], index: 2, kind: input, shape index: {}]   ;;  %s416_s3 = inlined_call_operand.hbm [shape: f32[1,256], index: 3, kind: output, shape index: {}]  }
   0x1   :  { %9 = vsyncpa [#allocation7], 0 }
   0x2   :  { %10 = vsyncpa [#allocation5], 0  ;;  %s353_s12 = smov [#allocation3]   ;;  %s354_s14 = smov [#allocation6]  }
   0x3   :  { %s17_s13 = sshll.u32 %s353_s12, 4  ;;  %s26_s15 = sshll.u32 %s354_s14, 4  ;;  %s18_s13 = int_to_ptr.vmem [resolvable:$true] %s17_s13  ;;  %s27_s15 = int_to_ptr.vmem [resolvable:$true] %s26_s15 }
   0x4   :  { %s295_s16 = scalar_lea.vmem %s18_s13, 32  ;;  %p300_p1 = scmp.lt.s32.totalorder %s18_s13, %s18_s13 }
   0x5   :  { %p296_p0 = scmp.ne.s32.totalorder %s18_s13, %s295_s16  ;;  %p301_p2 = scmp.lt.s32.totalorder %s295_s16, %s295_s16 }
   0x7   :  { %p302_p3 = por %p301_p2, %p300_p1 }
   0x9   :  { %p303_p4 = pnand %p302_p3, %p296_p0 }
   0xb   :  { %306 = shalt.err (!%p303_p4)
}
   0xc   :  { %20 = dma.hbm_to_vmem [thread:$0]  %s413_s0, 32, %s18_s13, [#allocation4]  }
   0xd   :  { %s315_s19 = scalar_lea.vmem %s27_s15, 4096  ;;  %p320_p6 = scmp.lt.s32.totalorder %s27_s15, %s27_s15 }
   0xe   :  { %p316_p5 = scmp.ne.s32.totalorder %s27_s15, %s315_s19  ;;  %p321_p7 = scmp.lt.s32.totalorder %s315_s19, %s315_s19 }
  0x10   :  { %p322_p8 = por %p321_p7, %p320_p6 }
  0x12   :  { %p323_p9 = pnand %p322_p8, %p316_p5 }
  0x14   :  { %326 = shalt.err (!%p323_p9)
}
  0x15   :  { %s355_s20 = smov 128   ;;  %s356_s21 = smov 8  }
  0x16   :  { %32 = dma.hbm_to_vmem [thread:$0]  %s414_s1, 4096, %s27_s15, [#allocation7], %s355_s20, %s355_s20, %s356_s21  }
  0x17   :  { %347 = dma.done.wait [#allocation4], 32  }
  0x18   :  { %348 = vsyncadd [#allocation4], 4294967264 }
  0x19   :  { %349 = dma.done.wait [#allocation7], 4096  }
  0x1a   :  { %350 = vsyncadd [#allocation7], 4294963200  ;;  %v65_v0 = vld [vmem:[#allocation6 + $0x78] sm:$0xff]  ;;  %v64_v1 = vld [vmem:[#allocation6 + $0x70] sm:$0xff]  ;;  %v45_v12 = vlaneseq  ;;  %s359_s24 = smov [#allocation8]  }
  0x1b   :  { %v63_v2 = vld [vmem:[#allocation6 + $0x68] sm:$0xff]  ;;  %v113_v3 = vunpack.c.h.bf16 %v65_v0  ;;  %v112_v4 = vunpack.c.l.bf16 %v65_v0  ;;  %v111_v5 = vunpack.c.h.bf16 %v64_v1  ;;  %v110_v6 = vunpack.c.l.bf16 %v64_v1  ;;  %v62_v7 = vld [vmem:[#allocation6 + $0x60] sm:$0xff]  ;;  %v61_v10 = vld [vmem:[#allocation6 + $0x58] sm:$0xff]  ;;  %s269_s25 = sshll.u32 %s359_s24, 4  ;;  %s270_s25 = int_to_ptr.vmem [resolvable:$true] %s269_s25 }
  0x1c   :  { %v109_v8 = vunpack.c.h.bf16 %v63_v2  ;;  %v108_v9 = vunpack.c.l.bf16 %v63_v2  ;;  %v107_v11 = vunpack.c.h.bf16 %v62_v7  ;;  %v106_v13 = vunpack.c.l.bf16 %v62_v7  ;;  %v60_v14 = vld [vmem:[#allocation6 + $0x50] sm:$0xff]  ;;  %v59_v17 = vld [vmem:[#allocation6 + $0x48] sm:$0xff]  ;;  %v58_v21 = vld [vmem:[#allocation6 + $0x40] sm:$0xff]  ;;  %s327_s26 = scalar_lea.vmem %s270_s25, 32  ;;  %p332_p11 = scmp.lt.s32.totalorder %s270_s25, %s270_s25 }
  0x1d   :  { %159 = vmatprep.subr.mxu0 %v113_v3  ;;  %v105_v15 = vunpack.c.h.bf16 %v61_v10  ;;  %v104_v16 = vunpack.c.l.bf16 %v61_v10  ;;  %v103_v18 = vunpack.c.h.bf16 %v60_v14  ;;  %v387_v19 = vshrl.u32 %v45_v12, 7  ;;  %v57_v24 = vld [vmem:[#allocation6 + $0x38] sm:$0xff]  ;;  %v56_v28 = vld [vmem:[#allocation6 + $0x30] sm:$0xff]  ;;  %v55_v32 = vld [vmem:[#allocation6 + $0x28] sm:$0xff]  ;;  %p328_p10 = scmp.ne.s32.totalorder %s270_s25, %s327_s26  ;;  %p333_p12 = scmp.lt.s32.totalorder %s327_s26, %s327_s26 }
  0x1e   :  { %160 = vmatpush1.msra.mxu0 %v112_v4  ;;  %v102_v20 = vunpack.c.l.bf16 %v60_v14  ;;  %v101_v22 = vunpack.c.h.bf16 %v59_v17  ;;  %v100_v23 = vunpack.c.l.bf16 %v59_v17  ;;  %v99_v25 = vunpack.c.h.bf16 %v58_v21  ;;  %v390_v29 = vld [vmem:[#allocation3] sm:$0x3]  ;;  %v54_v36 = vld [vmem:[#allocation6 + $0x20] sm:$0xff]  ;;  %v52_v42 = vld [vmem:[#allocation6 + $0x10] sm:$0xff] }
  0x1f   :  { %161 = vmatprep.subr.mxu0 %v111_v5  ;;  %v155_v26 = vsub.s32 1, %v387_v19  ;;  %v98_v27 = vunpack.c.l.bf16 %v58_v21  ;;  %v97_v30 = vunpack.c.h.bf16 %v57_v24  ;;  %v96_v31 = vunpack.c.l.bf16 %v57_v24  ;;  %v53_v39 = vld [vmem:[#allocation6 + $0x18] sm:$0xff]  ;;  %v51_v45 = vld [vmem:[#allocation6 + $0x8] sm:$0xff]  ;;  %v50_v48 = vld [vmem:[#allocation6] sm:$0xff]  ;;  %p334_p13 = por %p333_p12, %p332_p11 }
  0x20   :  { %162 = vmatpush1.msra.mxu0 %v110_v6  ;;  %v95_v33 = vunpack.c.h.bf16 %v56_v28  ;;  %v94_v35 = vunpack.c.l.bf16 %v56_v28  ;;  %v93_v37 = vunpack.c.h.bf16 %v55_v32  ;;  %v92_v38 = vunpack.c.l.bf16 %v55_v32  ;;  %v81_v51 = vld [vmem:[#allocation6 + $0xf8] sm:$0xff]  ;;  %v80_v54 = vld [vmem:[#allocation6 + $0xf0] sm:$0xff]  ;;  %v79_v57 = vld [vmem:[#allocation6 + $0xe8] sm:$0xff] }
  0x21   :  { %163 = vmatprep.subr.mxu0 %v109_v8  ;;  %v156_v34 = vrot.slane %v390_v29, %v155_v26  ;;  %v91_v40 = vunpack.c.h.bf16 %v54_v36  ;;  %v90_v41 = vunpack.c.l.bf16 %v54_v36  ;;  %v89_v43 = vunpack.c.h.bf16 %v53_v39  ;;  %v78_v60 = vld [vmem:[#allocation6 + $0xe0] sm:$0xff]  ;;  %v77_v63 = vld [vmem:[#allocation6 + $0xd8] sm:$0xff]  ;;  %v76_v2 = vld [vmem:[#allocation6 + $0xd0] sm:$0xff]  ;;  %p335_p0 = pnand %p334_p13, %p328_p10 }
  0x22   :  { %164 = vmatpush1.msra.mxu0 %v108_v9  ;;  %v88_v44 = vunpack.c.l.bf16 %v53_v39  ;;  %v87_v46 = vunpack.c.h.bf16 %v52_v42  ;;  %v86_v47 = vunpack.c.l.bf16 %v52_v42  ;;  %v85_v49 = vunpack.c.h.bf16 %v51_v45  ;;  %v75_v5 = vld [vmem:[#allocation6 + $0xc8] sm:$0xff]  ;;  %v74_v8 = vld [vmem:[#allocation6 + $0xc0] sm:$0xff]  ;;  %v68_v28 = vld [vmem:[#allocation6 + $0x90] sm:$0xff] }
  0x23   :  { %165 = vmatprep.subr.mxu0 %v107_v11  ;;  %223 = vmatprep.mubr.f32.mxu0 %v156_v34  ;;  %v84_v50 = vunpack.c.l.bf16 %v51_v45  ;;  %v83_v52 = vunpack.c.h.bf16 %v50_v48  ;;  %v82_v53 = vunpack.c.l.bf16 %v50_v48  ;;  %v145_v55 = vunpack.c.h.bf16 %v81_v51  ;;  %v73_v11 = vld [vmem:[#allocation6 + $0xb8] sm:$0xff]  ;;  %v67_v32 = vld [vmem:[#allocation6 + $0x88] sm:$0xff] }
  0x24   :  { %166 = vmatpush1.msra.mxu0 %v106_v13  ;;  %v144_v56 = vunpack.c.l.bf16 %v81_v51  ;;  %v143_v58 = vunpack.c.h.bf16 %v80_v54  ;;  %v142_v59 = vunpack.c.l.bf16 %v80_v54  ;;  %v141_v61 = vunpack.c.h.bf16 %v79_v57 }
  0x25   :  { %167 = vmatprep.subr.mxu0 %v105_v15  ;;  %v140_v62 = vunpack.c.l.bf16 %v79_v57  ;;  %v139_v0 = vunpack.c.h.bf16 %v78_v60  ;;  %v138_v1 = vunpack.c.l.bf16 %v78_v60  ;;  %v137_v3 = vunpack.c.h.bf16 %v77_v63  ;;  %v72_v15 = vld [vmem:[#allocation6 + $0xb0] sm:$0xff] }
  0x26   :  { %168 = vmatpush1.msra.mxu0 %v104_v16  ;;  %v136_v4 = vunpack.c.l.bf16 %v77_v63  ;;  %v135_v6 = vunpack.c.h.bf16 %v76_v2  ;;  %v134_v7 = vunpack.c.l.bf16 %v76_v2  ;;  %v133_v9 = vunpack.c.h.bf16 %v75_v5 }
  0x27   :  { %169 = vmatprep.subr.mxu0 %v103_v18  ;;  %v132_v10 = vunpack.c.l.bf16 %v75_v5  ;;  %v131_v13 = vunpack.c.h.bf16 %v74_v8  ;;  %v130_v14 = vunpack.c.l.bf16 %v74_v8  ;;  %v129_v16 = vunpack.c.h.bf16 %v73_v11  ;;  %v71_v18 = vld [vmem:[#allocation6 + $0xa8] sm:$0xff] }
  0x28   :  { %170 = vmatpush1.msra.mxu0 %v102_v20  ;;  %v128_v17 = vunpack.c.l.bf16 %v73_v11  ;;  %v127_v20 = vunpack.c.h.bf16 %v72_v15  ;;  %v126_v21 = vunpack.c.l.bf16 %v72_v15  ;;  %v124_v24 = vunpack.c.l.bf16 %v71_v18 }
  0x29   :  { %171 = vmatprep.subr.mxu0 %v101_v22  ;;  %v70_v22 = vld [vmem:[#allocation6 + $0xa0] sm:$0xff]  ;;  %v118_v34 = vunpack.c.l.bf16 %v68_v28  ;;  %v117_v36 = vunpack.c.h.bf16 %v67_v32  ;;  %vm396_vm0 = vcmp.lt.s32.totalorder %v45_v12, 256 }
  0x2a   :  { %172 = vmatpush1.msra.mxu0 %v100_v23  ;;  %v125_v23 = vunpack.c.h.bf16 %v71_v18  ;;  %v123_v26 = vunpack.c.h.bf16 %v70_v22 }
  0x2b   :  { %173 = vmatprep.subr.mxu0 %v99_v25  ;;  %v69_v25 = vld [vmem:[#allocation6 + $0x98] sm:$0xff] }
  0x2c   :  { %174 = vmatpush1.msra.mxu0 %v98_v27  ;;  %v122_v27 = vunpack.c.l.bf16 %v70_v22 }
  0x2d   :  { %175 = vmatprep.subr.mxu0 %v97_v30  ;;  %v121_v30 = vunpack.c.h.bf16 %v69_v25 }
  0x2e   :  { %176 = vmatpush1.msra.mxu0 %v96_v31  ;;  %v120_v31 = vunpack.c.l.bf16 %v69_v25 }
  0x2f   :  { %177 = vmatprep.subr.mxu0 %v95_v33  ;;  %v119_v33 = vunpack.c.h.bf16 %v68_v28 }
  0x30   :  { %178 = vmatpush1.msra.mxu0 %v94_v35  ;;  %v66_v35 = vld [vmem:[#allocation6 + $0x80] sm:$0xff] }
  0x31   :  { %179 = vmatprep.subr.mxu0 %v93_v37  ;;  %v151_v37 = vsub.s32 0, %v387_v19  ;;  %v115_v39 = vunpack.c.h.bf16 %v66_v35 }
  0x32   :  { %180 = vmatpush1.msra.mxu0 %v92_v38  ;;  %v116_v38 = vunpack.c.l.bf16 %v67_v32 }
  0x33   :  { %181 = vmatprep.subr.mxu0 %v91_v40  ;;  %v114_v40 = vunpack.c.l.bf16 %v66_v35 }
  0x34   :  { %182 = vmatpush1.msra.mxu0 %v90_v41  ;;  %v152_v41 = vrot.slane %v390_v29, %v151_v37 }
  0x35   :  { %183 = vmatprep.subr.mxu0 %v89_v43  ;;  %v357_v43 = vmov 0.0  }
  0x36   :  { %184 = vmatpush1.msra.mxu0 %v88_v44  ;;  %49 = vst.msk [vmem:[#allocation2] sm:$0x3] %vm396_vm0, %v357_v43  ;;  %v358_v44 = vmov 1966171168  }
  0x37   :  { %185 = vmatprep.subr.mxu0 %v87_v46  ;;  %v234_v45 = vunpack.c.l.s4 %v358_v44 }
  0x38   :  { %186 = vmatpush1.msra.mxu0 %v86_v47 }
  0x39   :  { %187 = vmatprep.subr.mxu0 %v85_v49  ;;  %v235_v46 = vunpack.c.0.s8 %v234_v45 }
  0x3a   :  { %188 = vmatpush1.msra.mxu0 %v84_v50 }
  0x3b   :  { %189 = vmatprep.subr.mxu0 %v83_v52  ;;  %v238_v48 = vsub.s32 %v235_v46, %v387_v19 }
  0x3c   :  { %190 = vmatpush1.msra.mxu0 %v82_v53 }
  0x3d   :  { %191 = vmatprep.subr.mxu0 %v145_v55  ;;  %v146_v51 = vld [vmem:[#allocation2] sm:$0x3] }
  0x3e   :  { %192 = vmatpush2.msra.mxu0 %v144_v56  ;;  %v260_v55 = vld [vmem:[%s415_s2] sm:$0x3] }
  0x3f   :  { %193 = vmatprep.subr.mxu0 %v143_v58 }
  0x40   :  { %194 = vmatpush2.msra.mxu0 %v142_v59 }
  0x41   :  { %195 = vmatprep.subr.mxu0 %v141_v61 }
  0x42   :  { %196 = vmatpush2.msra.mxu0 %v140_v62 }
  0x43   :  { %197 = vmatprep.subr.mxu0 %v139_v0 }
  0x44   :  { %198 = vmatpush2.msra.mxu0 %v138_v1 }
  0x45   :  { %199 = vmatprep.subr.mxu0 %v137_v3 }
  0x46   :  { %200 = vmatpush2.msra.mxu0 %v136_v4 }
  0x47   :  { %201 = vmatprep.subr.mxu0 %v135_v6 }
  0x48   :  { %202 = vmatpush2.msra.mxu0 %v134_v7 }
  0x49   :  { %203 = vmatprep.subr.mxu0 %v133_v9 }
  0x4a   :  { %204 = vmatpush2.msra.mxu0 %v132_v10 }
  0x4b   :  { %205 = vmatprep.subr.mxu0 %v131_v13 }
  0x4c   :  { %206 = vmatpush2.msra.mxu0 %v130_v14 }
  0x4d   :  { %207 = vmatprep.subr.mxu0 %v129_v16 }
  0x4e   :  { %208 = vmatpush2.msra.mxu0 %v128_v17 }
  0x4f   :  { %209 = vmatprep.subr.mxu0 %v127_v20 }
  0x50   :  { %210 = vmatpush2.msra.mxu0 %v126_v21 }
  0x51   :  { %211 = vmatprep.subr.mxu0 %v125_v23 }
  0x52   :  { %212 = vmatpush2.msra.mxu0 %v124_v24 }
  0x53   :  { %213 = vmatprep.subr.mxu0 %v123_v26 }
  0x54   :  { %214 = vmatpush2.msra.mxu0 %v122_v27 }
  0x55   :  { %215 = vmatprep.subr.mxu0 %v121_v30 }
  0x56   :  { %216 = vmatpush2.msra.mxu0 %v120_v31 }
  0x57   :  { %217 = vmatprep.subr.mxu0 %v119_v33 }
  0x58   :  { %218 = vmatpush2.msra.mxu0 %v118_v34 }
  0x59   :  { %219 = vmatprep.subr.mxu0 %v117_v36 }
  0x5a   :  { %220 = vmatpush2.msra.mxu0 %v116_v38 }
  0x5b   :  { %221 = vmatprep.subr.mxu0 %v115_v39 }
  0x5c   :  { %222 = vmatpush2.msra.mxu0 %v114_v40 }
  0x5d   :  { %224 = vmatmul.mubr.f32.vlgmr.msra.gmra.mxu0 %v152_v41 }
 0x11d   :  { %v225_v47 = vpop.f32.mrf.mxu0 }
 0x11f   :  { %v227_v29 = vpop.f32.mrf.mxu0 }
 0x120   :  { %v232_v49 = vcombine.low %v225_v47, %v227_v29 }
 0x122   :  { %v239_v50 = vrot.slane %v232_v49, %v238_v48 }
 0x124   :  { %v246_v52 = vrot.slane %v239_v50, %v238_v48 }
 0x126   :  { %v248_v53 = vadd.f32 %v246_v52, %v146_v51 }
 0x128   :  { %253 = vst.msk [vmem:[#allocation2] sm:$0x3] %vm396_vm0, %v248_v53 }
 0x12f   :  { %v257_v12 = vld [vmem:[#allocation2] sm:$0x3] }
 0x130   :  { %v279_v54 = vadd.f32 -1.0, %v257_v12 }
 0x132   :  { %v259_v56 = vmul.f32 %v279_v54, %v279_v54 }
 0x134   :  { %v261_v57 = vmul.f32 %v260_v55, %v259_v56 }
 0x136   :  { %262 = vst.msk [vmem:[#allocation8] sm:$0x3] %vm396_vm0, %v261_v57 }
 0x137   :  { %338 = shalt.err (!%p335_p0)
}
 0x138   :  { %272 = dma.vmem_to_hbm [thread:$0]  %s270_s25, 32, %s416_s3, [#allocation5]  }
 0x139   :  { %351 = dma.done.wait [#allocation5], 32  }
 0x13a   :  { %352 = vsyncadd [#allocation5], 4294967264 }
 0x13b   :  { %276 = vsyncpa [#allocation4], 1 }
 0x13c   :  { %277 = vsyncpa [#allocation7], 1 }
 0x13d   :  { %278 = vsyncpa [#allocation5], 1 }

</bundles_post_ra>
